<compile_context>
chip_gen: v7x
topology: tpu7x:2x2x1
jax: 0.10.0
libtpu: 0.0.40
codegen_flags: <defaults>
</compile_context>

<pallas_src>
import functools

import jax
import jax.numpy as jnp
from jax.experimental import pallas as pl
from jax.experimental.pallas import tpu as pltpu

ALPHA = 10.0
EPS2 = 0.001 ** 2
S1 = 10.0
S2 = 1.0

_SOBEL_X = ((-1.0, 0.0, 1.0), (-2.0, 0.0, 2.0), (-1.0, 0.0, 1.0))
_SOBEL_Y = ((-1.0, -2.0, -1.0), (0.0, 0.0, 0.0), (1.0, 2.0, 1.0))
_LAPLACE = ((-1.0, -1.0, -1.0), (-1.0, 8.0, -1.0), (-1.0, -1.0, -1.0))


def _round_up(x, m):
    return (x + m - 1) // m * m


def _roll(x, shift, axis):
    """jnp.roll semantics, lowered to the XLU rotate unit (idle slot here)."""
    n = x.shape[axis]
    return pltpu.roll(x, shift % n, axis)


def _charbonnier(s):
    return jnp.sqrt(s * s + jnp.float32(EPS2))


def _stencils(x):
    """Sobel-X, Sobel-Y and Laplacian of one (Hp, Wp) zero-padded image.

    All three 3x3 filters decompose onto shared vertical partials:
      sobel_x  = vertical [1,2,1]   then horizontal [-1,0,1]
      sobel_y  = vertical [-1,0,1]  then horizontal [1,2,1]
      laplace  = 9*center - box3x3, box3x3 = vertical [1,1,1] then horiz [1,1,1]
    so only 2 sublane rolls + 6 lane rolls are needed per image.
    """
    xm1 = _roll(x, 1, 0)     # x[y-1, :]
    xp1 = _roll(x, -1, 0)    # x[y+1, :]
    v121 = xm1 + 2.0 * x + xp1      # vertical [1, 2, 1]
    vgrad = xp1 - xm1               # vertical [-1, 0, 1]
    vbox = xm1 + x + xp1            # vertical [1, 1, 1]

    gx = _roll(v121, -1, 1) - _roll(v121, 1, 1)                   # horiz [-1,0,1]
    gy = _roll(vgrad, 1, 1) + 2.0 * vgrad + _roll(vgrad, -1, 1)   # horiz [1,2,1]
    box = _roll(vbox, 1, 1) + vbox + _roll(vbox, -1, 1)           # horiz [1,1,1]
    lap = 9.0 * x - box
    return gx, gy, lap


def _smooth_kernel(pred_ref, gt_ref, out_ref, *, valid_h, valid_w):
    pred = pred_ref[0].astype(jnp.float32)   # (Hp, Wp)
    gt = gt_ref[0].astype(jnp.float32)       # (Hp, Wp)
    hp, wp = pred.shape

    p_gx, p_gy, p_lap = _stencils(pred)
    g_gx, g_gy, g_lap = _stencils(gt)

    w_x = jnp.exp(jnp.abs(g_gx) * jnp.float32(-ALPHA))
    w_y = jnp.exp(jnp.abs(g_gy) * jnp.float32(-ALPHA))
    cps_x = _charbonnier(jnp.abs(p_gx) * w_x)
    cps_y = _charbonnier(jnp.abs(p_gy) * w_y)

    w_lap = jnp.exp(jnp.abs(g_lap) * jnp.float32(-ALPHA))
    cps_lap = _charbonnier(jnp.abs(p_lap) * w_lap)

    # s1*mean(cps_x+cps_y) + s2*mean(cps_lap) == sum(summand)/numel, so one
    # masked cross-lane reduction per image is enough.
    summand = jnp.float32(S1) * (cps_x + cps_y) + jnp.float32(S2) * cps_lap

    rows = jax.lax.broadcasted_iota(jnp.int32, (hp, wp), 0)
    cols = jax.lax.broadcasted_iota(jnp.int32, (hp, wp), 1)
    mask = (rows < valid_h) & (cols < valid_w)
    total = jnp.sum(jnp.where(mask, summand, jnp.float32(0.0)))

    out_ref[...] = jnp.reshape(total, (1, 1, 1))


@jax.jit
def smoothness_loss(pred, gt):
    """pred, gt: (N, 1, H, W) (NCHW, like the PyTorch module)."""
    N, C, H, W = pred.shape
    assert C == 1, "reference conv has a single input channel"

    # Lane-dense canvas: >=1 zero pad row/col (gives exact zero `same` padding
    # for the rolled stencils) rounded up to the native (8, 128) tile.
    Hp = _round_up(H + 1, 8)
    Wp = _round_up(W + 1, 128)
    pad = ((0, 0), (0, Hp - H), (0, Wp - W))
    p = jnp.pad(pred.reshape(N, H, W), pad)
    g = jnp.pad(gt.reshape(N, H, W), pad)

    # TODO(synk): for very large images (> ~0.5 MPix) tile over H with a
    # 1-row halo (grid=(N, H//TH)) instead of one whole-image block per step.
    img_bytes = Hp * Wp * 4
    vmem_est = img_bytes * (2 * 2 + 14)   # 2 inputs x 2 buffers + live temps
    vmem_limit = int(min(max(2 * vmem_est, 16 * 1024 * 1024),
                         40 * 1024 * 1024))  # stays safe on v7x's 64 MiB VMEM

    partials = pl.pallas_call(
        functools.partial(_smooth_kernel, valid_h=H, valid_w=W),
        out_shape=jax.ShapeDtypeStruct((N, 1, 1), jnp.float32),
        grid=(N,),
        in_specs=[
            pl.BlockSpec((1, Hp, Wp), lambda n: (n, 0, 0)),
            pl.BlockSpec((1, Hp, Wp), lambda n: (n, 0, 0)),
        ],
        out_specs=pl.BlockSpec((1, 1, 1), lambda n: (n, 0, 0)),
        compiler_params=pltpu.CompilerParams(
            dimension_semantics=("parallel",),
            vmem_limit_bytes=vmem_limit),
    )(p, g)

    numel = jnp.float32(N * C * H * W)
    return jnp.sum(partials) / numel


# ---------------- pure-JAX reference (for correctness check) ----------------
def _conv_ref(img_nchw, w):
    k = jnp.array(w, jnp.float32).reshape(1, 1, 3, 3)
    return jax.lax.conv_general_dilated(
        img_nchw, k, window_strides=(1, 1), padding=((1, 1), (1, 1)),
        dimension_numbers=("NCHW", "OIHW", "NCHW"))


def _ref_loss(pred, gt):
    sal_x = jnp.abs(_conv_ref(pred, _SOBEL_X))
    sal_y = jnp.abs(_conv_ref(pred, _SOBEL_Y))
    gt_x = _conv_ref(gt, _SOBEL_X)
    gt_y = _conv_ref(gt, _SOBEL_Y)
    w_x = jnp.exp(jnp.abs(gt_x) * -ALPHA)
    w_y = jnp.exp(jnp.abs(gt_y) * -ALPHA)
    cps_x = jnp.sqrt((sal_x * w_x) ** 2 + EPS2)
    cps_y = jnp.sqrt((sal_y * w_y) ** 2 + EPS2)
    cps_xy = cps_x + cps_y
    lap_sal = jnp.abs(_conv_ref(pred, _LAPLACE))
    lap_gt = jnp.abs(_conv_ref(gt, _LAPLACE))
    weight_lap = jnp.exp(lap_gt * -ALPHA)
    weighted_lap = jnp.sqrt((lap_sal * weight_lap) ** 2 + EPS2)
    return S1 * jnp.mean(cps_xy) + S2 * jnp.mean(weighted_lap)


if __name__ == "__main__":
    key = jax.random.PRNGKey(0)
    k1, k2 = jax.random.split(key)
    N, C, H, W = 2, 1, 16, 16
    pred = jax.random.uniform(k1, (N, C, H, W), dtype=jnp.float32)
    gt = (jax.random.uniform(k2, (N, C, H, W), dtype=jnp.float32) > 0.5
          ).astype(jnp.float32)

    loss = jax.block_until_ready(smoothness_loss(pred, gt))
    ref = jax.block_until_ready(_ref_loss(pred, gt))

    assert jnp.allclose(loss, ref, rtol=1e-4, atol=1e-4), (loss, ref)
    print("KERNEL_OK")
</pallas_src>

<mosaic_0001>
module attributes {stable_mosaic.version = 11 : i64} {
  func.func @_smooth_kernel(%arg0: i32, %arg1: memref<1x24x128xf32, #tpu.memory_space<vmem>>, %arg2: memref<1x24x128xf32, #tpu.memory_space<vmem>>, %arg3: memref<1x1x1xf32, #tpu.memory_space<vmem>>) attributes {dimension_semantics = [#tpu.dimension_semantics<parallel>], iteration_bounds = array<i64: 2>, scalar_prefetch = 0 : i64, scratch_operands = 0 : i64, tpu.core_type = #tpu.core_type<tc>, window_params = [{transform_indices = @transform_0, window_bounds = array<i64: 1, 24, 128>}, {transform_indices = @transform_1, window_bounds = array<i64: 1, 24, 128>}, {transform_indices = @transform_2, window_bounds = array<i64: 1, 1, 1>}]} {
    %c0 = arith.constant 0 : index
    %c0_0 = arith.constant 0 : index
    %c0_1 = arith.constant 0 : index
    %0 = vector.load %arg1[%c0, %c0_0, %c0_1] : memref<1x24x128xf32, #tpu.memory_space<vmem>>, vector<1x24x128xf32>
    %1 = vector.shape_cast %0 : vector<1x24x128xf32> to vector<24x128xf32>
    %c0_2 = arith.constant 0 : index
    %c0_3 = arith.constant 0 : index
    %c0_4 = arith.constant 0 : index
    %2 = vector.load %arg2[%c0_2, %c0_3, %c0_4] : memref<1x24x128xf32, #tpu.memory_space<vmem>>, vector<1x24x128xf32>
    %3 = vector.shape_cast %2 : vector<1x24x128xf32> to vector<24x128xf32>
    %c1_i32 = arith.constant 1 : i32
    %4 = tpu.dynamic_rotate %1 by %c1_i32 dim 0 : vector<24x128xf32>, i32 -> vector<24x128xf32>
    %c23_i32 = arith.constant 23 : i32
    %5 = tpu.dynamic_rotate %1 by %c23_i32 dim 0 : vector<24x128xf32>, i32 -> vector<24x128xf32>
    %cst = arith.constant 2.000000e+00 : f32
    %6 = vector.broadcast %cst : f32 to vector<24x128xf32>
    %7 = arith.mulf %6, %1 : vector<24x128xf32>
    %8 = arith.addf %4, %7 : vector<24x128xf32>
    %9 = arith.addf %8, %5 : vector<24x128xf32>
    %10 = arith.subf %5, %4 : vector<24x128xf32>
    %11 = arith.addf %4, %1 : vector<24x128xf32>
    %12 = arith.addf %11, %5 : vector<24x128xf32>
    %c127_i32 = arith.constant 127 : i32
    %13 = tpu.dynamic_rotate %9 by %c127_i32 dim 1 : vector<24x128xf32>, i32 -> vector<24x128xf32>
    %c1_i32_5 = arith.constant 1 : i32
    %14 = tpu.dynamic_rotate %9 by %c1_i32_5 dim 1 : vector<24x128xf32>, i32 -> vector<24x128xf32>
    %15 = arith.subf %13, %14 : vector<24x128xf32>
    %c1_i32_6 = arith.constant 1 : i32
    %16 = tpu.dynamic_rotate %10 by %c1_i32_6 dim 1 : vector<24x128xf32>, i32 -> vector<24x128xf32>
    %cst_7 = arith.constant 2.000000e+00 : f32
    %17 = vector.broadcast %cst_7 : f32 to vector<24x128xf32>
    %18 = arith.mulf %17, %10 : vector<24x128xf32>
    %19 = arith.addf %16, %18 : vector<24x128xf32>
    %c127_i32_8 = arith.constant 127 : i32
    %20 = tpu.dynamic_rotate %10 by %c127_i32_8 dim 1 : vector<24x128xf32>, i32 -> vector<24x128xf32>
    %21 = arith.addf %19, %20 : vector<24x128xf32>
    %c1_i32_9 = arith.constant 1 : i32
    %22 = tpu.dynamic_rotate %12 by %c1_i32_9 dim 1 : vector<24x128xf32>, i32 -> vector<24x128xf32>
    %23 = arith.addf %22, %12 : vector<24x128xf32>
    %c127_i32_10 = arith.constant 127 : i32
    %24 = tpu.dynamic_rotate %12 by %c127_i32_10 dim 1 : vector<24x128xf32>, i32 -> vector<24x128xf32>
    %25 = arith.addf %23, %24 : vector<24x128xf32>
    %cst_11 = arith.constant 9.000000e+00 : f32
    %26 = vector.broadcast %cst_11 : f32 to vector<24x128xf32>
    %27 = arith.mulf %26, %1 : vector<24x128xf32>
    %28 = arith.subf %27, %25 : vector<24x128xf32>
    %c1_i32_12 = arith.constant 1 : i32
    %29 = tpu.dynamic_rotate %3 by %c1_i32_12 dim 0 : vector<24x128xf32>, i32 -> vector<24x128xf32>
    %c23_i32_13 = arith.constant 23 : i32
    %30 = tpu.dynamic_rotate %3 by %c23_i32_13 dim 0 : vector<24x128xf32>, i32 -> vector<24x128xf32>
    %cst_14 = arith.constant 2.000000e+00 : f32
    %31 = vector.broadcast %cst_14 : f32 to vector<24x128xf32>
    %32 = arith.mulf %31, %3 : vector<24x128xf32>
    %33 = arith.addf %29, %32 : vector<24x128xf32>
    %34 = arith.addf %33, %30 : vector<24x128xf32>
    %35 = arith.subf %30, %29 : vector<24x128xf32>
    %36 = arith.addf %29, %3 : vector<24x128xf32>
    %37 = arith.addf %36, %30 : vector<24x128xf32>
    %c127_i32_15 = arith.constant 127 : i32
    %38 = tpu.dynamic_rotate %34 by %c127_i32_15 dim 1 : vector<24x128xf32>, i32 -> vector<24x128xf32>
    %c1_i32_16 = arith.constant 1 : i32
    %39 = tpu.dynamic_rotate %34 by %c1_i32_16 dim 1 : vector<24x128xf32>, i32 -> vector<24x128xf32>
    %40 = arith.subf %38, %39 : vector<24x128xf32>
    %c1_i32_17 = arith.constant 1 : i32
    %41 = tpu.dynamic_rotate %35 by %c1_i32_17 dim 1 : vector<24x128xf32>, i32 -> vector<24x128xf32>
    %cst_18 = arith.constant 2.000000e+00 : f32
    %42 = vector.broadcast %cst_18 : f32 to vector<24x128xf32>
    %43 = arith.mulf %42, %35 : vector<24x128xf32>
    %44 = arith.addf %41, %43 : vector<24x128xf32>
    %c127_i32_19 = arith.constant 127 : i32
    %45 = tpu.dynamic_rotate %35 by %c127_i32_19 dim 1 : vector<24x128xf32>, i32 -> vector<24x128xf32>
    %46 = arith.addf %44, %45 : vector<24x128xf32>
    %c1_i32_20 = arith.constant 1 : i32
    %47 = tpu.dynamic_rotate %37 by %c1_i32_20 dim 1 : vector<24x128xf32>, i32 -> vector<24x128xf32>
    %48 = arith.addf %47, %37 : vector<24x128xf32>
    %c127_i32_21 = arith.constant 127 : i32
    %49 = tpu.dynamic_rotate %37 by %c127_i32_21 dim 1 : vector<24x128xf32>, i32 -> vector<24x128xf32>
    %50 = arith.addf %48, %49 : vector<24x128xf32>
    %cst_22 = arith.constant 9.000000e+00 : f32
    %51 = vector.broadcast %cst_22 : f32 to vector<24x128xf32>
    %52 = arith.mulf %51, %3 : vector<24x128xf32>
    %53 = arith.subf %52, %50 : vector<24x128xf32>
    %54 = math.absf %40 : vector<24x128xf32>
    %cst_23 = arith.constant -1.000000e+01 : f32
    %55 = vector.broadcast %cst_23 : f32 to vector<24x128xf32>
    %56 = arith.mulf %54, %55 : vector<24x128xf32>
    %57 = math.exp %56 : vector<24x128xf32>
    %58 = math.absf %46 : vector<24x128xf32>
    %cst_24 = arith.constant -1.000000e+01 : f32
    %59 = vector.broadcast %cst_24 : f32 to vector<24x128xf32>
    %60 = arith.mulf %58, %59 : vector<24x128xf32>
    %61 = math.exp %60 : vector<24x128xf32>
    %62 = math.absf %15 : vector<24x128xf32>
    %63 = arith.mulf %62, %57 : vector<24x128xf32>
    %64 = arith.mulf %63, %63 : vector<24x128xf32>
    %cst_25 = arith.constant 9.99999997E-7 : f32
    %65 = vector.broadcast %cst_25 : f32 to vector<24x128xf32>
    %66 = arith.addf %64, %65 : vector<24x128xf32>
    %67 = math.sqrt %66 : vector<24x128xf32>
    %68 = math.absf %21 : vector<24x128xf32>
    %69 = arith.mulf %68, %61 : vector<24x128xf32>
    %70 = arith.mulf %69, %69 : vector<24x128xf32>
    %cst_26 = arith.constant 9.99999997E-7 : f32
    %71 = vector.broadcast %cst_26 : f32 to vector<24x128xf32>
    %72 = arith.addf %70, %71 : vector<24x128xf32>
    %73 = math.sqrt %72 : vector<24x128xf32>
    %74 = math.absf %53 : vector<24x128xf32>
    %cst_27 = arith.constant -1.000000e+01 : f32
    %75 = vector.broadcast %cst_27 : f32 to vector<24x128xf32>
    %76 = arith.mulf %74, %75 : vector<24x128xf32>
    %77 = math.exp %76 : vector<24x128xf32>
    %78 = math.absf %28 : vector<24x128xf32>
    %79 = arith.mulf %78, %77 : vector<24x128xf32>
    %80 = arith.mulf %79, %79 : vector<24x128xf32>
    %cst_28 = arith.constant 9.99999997E-7 : f32
    %81 = vector.broadcast %cst_28 : f32 to vector<24x128xf32>
    %82 = arith.addf %80, %81 : vector<24x128xf32>
    %83 = math.sqrt %82 : vector<24x128xf32>
    %84 = arith.addf %67, %73 : vector<24x128xf32>
    %cst_29 = arith.constant 1.000000e+01 : f32
    %85 = vector.broadcast %cst_29 : f32 to vector<24x128xf32>
    %86 = arith.mulf %85, %84 : vector<24x128xf32>
    %cst_30 = arith.constant 1.000000e+00 : f32
    %87 = vector.broadcast %cst_30 : f32 to vector<24x128xf32>
    %88 = arith.mulf %87, %83 : vector<24x128xf32>
    %89 = arith.addf %86, %88 : vector<24x128xf32>
    %90 = tpu.iota {dimensions = array<i32: 0>} : vector<24x128xi32>
    %91 = tpu.iota {dimensions = array<i32: 1>} : vector<24x128xi32>
    %c16_i32 = arith.constant 16 : i32
    %92 = vector.broadcast %c16_i32 : i32 to vector<24x128xi32>
    %93 = arith.cmpi slt, %90, %92 : vector<24x128xi32>
    %c16_i32_31 = arith.constant 16 : i32
    %94 = vector.broadcast %c16_i32_31 : i32 to vector<24x128xi32>
    %95 = arith.cmpi slt, %91, %94 : vector<24x128xi32>
    %96 = arith.andi %93, %95 : vector<24x128xi1>
    %cst_32 = arith.constant 0.000000e+00 : f32
    %97 = vector.broadcast %cst_32 : f32 to vector<24x128xf32>
    %98 = arith.select %96, %89, %97 : vector<24x128xi1>, vector<24x128xf32>
    %99 = vector.shape_cast %98 : vector<24x128xf32> to vector<1x24x128xf32>
    %cst_33 = arith.constant dense<0.000000e+00> : vector<1xf32>
    %100 = vector.multi_reduction <add>, %99, %cst_33 [1, 2] : vector<1x24x128xf32> to vector<1xf32>
    %101 = vector.shape_cast %100 : vector<1xf32> to vector<1x1x1xf32>
    %102 = vector.extract %101[0, 0, 0] : f32 from vector<1x1x1xf32>
    %103 = vector.broadcast %102 : f32 to vector<1x1x1xf32>
    %c0_34 = arith.constant 0 : index
    %c0_35 = arith.constant 0 : index
    %c0_36 = arith.constant 0 : index
    %104 = vector.load %arg3[%c0_34, %c0_35, %c0_36] : memref<1x1x1xf32, #tpu.memory_space<vmem>>, vector<1x1x1xf32>
    tpu.vector_store %arg3[%c0_34, %c0_35, %c0_36], %103 {strides = array<i32>} : memref<1x1x1xf32, #tpu.memory_space<vmem>>, vector<1x1x1xf32>,
    return
  }
  func.func @transform_0(%arg0: i32) -> (i32, i32, i32) {
    %c0_i32 = arith.constant 0 : i32
    %c0_i32_0 = arith.constant 0 : i32
    %c0_i32_1 = arith.constant 0 : i32
    return %arg0, %c0_i32, %c0_i32_0 : i32, i32, i32
  }
  func.func @transform_1(%arg0: i32) -> (i32, i32, i32) {
    %c0_i32 = arith.constant 0 : i32
    %c0_i32_0 = arith.constant 0 : i32
    %c0_i32_1 = arith.constant 0 : i32
    return %arg0, %c0_i32, %c0_i32_0 : i32, i32, i32
  }
  func.func @transform_2(%arg0: i32) -> (i32, i32, i32) {
    %c0_i32 = arith.constant 0 : i32
    %c0_i32_0 = arith.constant 0 : i32
    %c0_i32_1 = arith.constant 0 : i32
    return %arg0, %c0_i32, %c0_i32_0 : i32, i32, i32
  }
}

</mosaic_0001>

<bundles_post_ra>
// kernel: smoothness_loss.1
= control target key start
LH: loop header
LB: loop body
LE: loop exit
PB: predicated region body
PF: predicated region fallthrough
CT: control target
= control target key end

     0   :  { %s652_s9 = smov 0   ;;  %s790_s0 = inlined_call_operand.vmem [shape: f32[2,24,128], index: 0, kind: input, shape index: {}]   ;;  %s791_s1 = inlined_call_operand.vmem [shape: f32[2,24,128], index: 1, kind: input, shape index: {}]   ;;  %s792_s2 = inlined_call_operand.vmem [shape: f32[2,1,1], index: 2, kind: output, shape index: {}]  }
   0x1 LB: > { %s581_s10 = sadd.s32 4294967295, %s633_s9   ;;  %p585_p0 = scmp.ge.s32.totalorder %s633_s9, 1  ;;  %s633_s9 = sphi %s652_s9, %s12_s9  }
   0x2   : > { %p122_p1 = scmp.lt.s32.totalorder %s633_s9, 3 }
   0x4   : > { %p123_p2 = pnand %p585_p0, %p122_p1 }
   0x5   : > { %p147_p3 = scmp.lt.s32.totalorder (!%p123_p2), %s581_s10, 1  ;;  %v169_v0 = vlaneseq (!%p123_p2)  ;;  %s635_s15 = smov (!%p123_p2), 1   ;;  %vm520_vm15 = vcmask (!%p123_p2), 0  }
   0x6   : > { %126 = sbr.rel (%p123_p2) target bundleno = 421 (0x1a5), region = 28  ;;  %s636_s16 = smov (!%p123_p2), 127  }
   0x7   : > { %v170_v1 = vshrl.u32 (!%p123_p2), %v169_v0, 7 }
   0x9   : > { %vm171_vm0 = vcmp.lt.s32.totalorder (!%p123_p2), %v170_v1, 1  ;;  %vm178_vm1 = vcmp.lt.s32.totalorder (!%p123_p2), %v170_v1, 7 }
   0xd   : > { %s794_s10 = smov (!%p147_p3, %s581_s10), 1 }
   0xe   : > { %s590_s11 = smul.u32 24, %s794_s10  ;;  %s159_s22 = scalar_lea.vmem %s792_s2, %s794_s10 }
  0x10   : > { %s156_s14 = scalar_lea.vmem %s791_s1, %s590_s11  ;;  %s151_s19 = scalar_lea.vmem %s790_s0, %s590_s11 }
  0x11   : > { %v669_v2 = vld [vmem:[%s156_s14] sm:$0xff]  ;;  %v671_v3 = vld [vmem:[%s156_s14 + $0x8] sm:$0xff]  ;;  %v165_v4 = vld [vmem:[%s156_s14 + $0x10] sm:$0xff] }
  0x12   : > { %v260_v5 = vrot.slane %v669_v2, 7  ;;  %v262_v6 = vrot.slane %v165_v4, 7  ;;  %v266_v7 = vrot.slane %v669_v2, 1  ;;  %v267_v8 = vrot.slane %v671_v3, 1  ;;  %v704_v25 = vld [vmem:[%s151_s19] sm:$0xff]  ;;  %v706_v26 = vld [vmem:[%s151_s19 + $0x8] sm:$0xff] }
  0x13   : > { %v261_v9 = vrot.slane %v671_v3, 7  ;;  %v268_v10 = vrot.slane %v165_v4, 1  ;;  %v272_v11 = vmul.f32 2.0, %v669_v2  ;;  %v273_v14 = vmul.f32 2.0, %v671_v3  ;;  %v162_v27 = vld [vmem:[%s151_s19 + $0x10] sm:$0xff] }
  0x14   : > { %v265_v12 = vsel %vm171_vm0, %v262_v6, %v260_v5  ;;  %v270_v13 = vsel %vm178_vm1, %v266_v7, %v267_v8  ;;  %v166_v29 = vrot.slane %v704_v25, 7  ;;  %v168_v31 = vrot.slane %v162_v27, 7 }
  0x15   : > { %v681_v15 = vsub.f32 %v270_v13, %v265_v12  ;;  %v264_v16 = vsel %vm171_vm0, %v260_v5, %v261_v9  ;;  %v269_v17 = vsel %vm178_vm1, %v267_v8, %v268_v10  ;;  %v275_v18 = vadd.f32 %v272_v11, %v265_v12 }
  0x16   : > { %v685_v19 = vsub.f32 %v269_v17, %v264_v16  ;;  %v276_v21 = vadd.f32 %v273_v14, %v264_v16  ;;  %v284_v23 = vadd.f32 %v265_v12, %v669_v2  ;;  %v285_v24 = vadd.f32 %v264_v16, %v671_v3 }
  0x17   : > { %305 = vrot.lane.b32.xlu0 %v681_v15, %s635_s15  ;;  %v278_v20 = vadd.f32 %v275_v18, %v270_v13  ;;  %v175_v32 = vrot.slane %v704_v25, 1  ;;  %v176_v33 = vrot.slane %v706_v26, 1  ;;  %v167_v34 = vrot.slane %v706_v26, 7 }
  0x18   : > { %319 = vrot.lane.b32.xlu1 %v685_v19, %s636_s16  ;;  %v279_v22 = vadd.f32 %v276_v21, %v269_v17  ;;  %v709_v28 = vadd.f32 %v284_v23, %v270_v13  ;;  %v713_v30 = vadd.f32 %v285_v24, %v269_v17  ;;  %v177_v35 = vrot.slane %v162_v27, 1 }
  0x19   : > { %v182_v36 = vmul.f32 2.0, %v704_v25  ;;  %v174_v37 = vsel %vm171_vm0, %v168_v31, %v166_v29  ;;  %v180_v38 = vsel %vm178_vm1, %v175_v32, %v176_v33  ;;  %v183_v39 = vmul.f32 2.0, %v706_v26 }
  0x1a   : > { %v173_v40 = vsel %vm171_vm0, %v166_v29, %v167_v34  ;;  %v179_v41 = vsel %vm178_vm1, %v176_v33, %v177_v35  ;;  %v730_v42 = vsub.f32 %v180_v38, %v174_v37  ;;  %v194_v48 = vadd.f32 %v174_v37, %v704_v25 }
  0x1b   : > { %307 = vrot.lane.b32.xlu0 %v685_v19, %s635_s15  ;;  %v185_v43 = vadd.f32 %v182_v36, %v174_v37  ;;  %v734_v44 = vsub.f32 %v179_v41, %v173_v40  ;;  %v186_v45 = vadd.f32 %v183_v39, %v173_v40  ;;  %v195_v49 = vadd.f32 %v173_v40, %v706_v26 }
  0x1c   : > { %290 = vrot.lane.b32.xlu1 %v278_v20, %s636_s16  ;;  %v748_v50 = vadd.f32 %v194_v48, %v180_v38  ;;  %v312_v56 = vmul.f32 2.0, %v685_v19  ;;  %v311_v57 = vmul.f32 2.0, %v681_v15  ;;  %v344_v17 = vmul.f32 9.0, %v669_v2 }
  0x1d   : > { %v188_v46 = vadd.f32 %v185_v43, %v180_v38  ;;  %v189_v47 = vadd.f32 %v186_v45, %v179_v41  ;;  %v752_v51 = vadd.f32 %v195_v49, %v179_v41  ;;  %v222_v39 = vmul.f32 2.0, %v734_v44 }
  0x1f   : > { %317 = vrot.lane.b32.xlu0 %v681_v15, %s636_s16 }
  0x20   : > { %292 = vrot.lane.b32.xlu1 %v279_v22, %s636_s16 }
  0x23   : > { %296 = vrot.lane.b32.xlu0 %v278_v20, %s635_s15  ;;  %v345_v20 = vmul.f32 9.0, %v671_v3  ;;  %v221_v3 = vmul.f32 2.0, %v730_v42 }
  0x24   : > { %298 = vrot.lane.b32.xlu1 %v279_v22, %s635_s15 }
  0x27   : > { %326 = vrot.lane.b32.xlu0 %v709_v28, %s635_s15 }
  0x28   : > { %328 = vrot.lane.b32.xlu1 %v713_v30, %s635_s15 }
  0x2b   : > { %335 = vrot.lane.b32.xlu0 %v709_v28, %s636_s16 }
  0x2c   : > { %337 = vrot.lane.b32.xlu1 %v713_v30, %s636_s16 }
  0x2f   : > { %215 = vrot.lane.b32.xlu0 %v730_v42, %s635_s15 }
  0x30   : > { %217 = vrot.lane.b32.xlu1 %v734_v44, %s635_s15 }
  0x33   : > { %200 = vrot.lane.b32.xlu0 %v188_v46, %s636_s16 }
  0x34   : > { %202 = vrot.lane.b32.xlu1 %v189_v47, %s636_s16 }
  0x37   : > { %206 = vrot.lane.b32.xlu0 %v188_v46, %s635_s15 }
  0x38   : > { %208 = vrot.lane.b32.xlu1 %v189_v47, %s635_s15 }
  0x3b   : > { %227 = vrot.lane.b32.xlu0 %v730_v42, %s636_s16 }
  0x3c   : > { %229 = vrot.lane.b32.xlu1 %v734_v44, %s636_s16 }
  0x3f   : > { %236 = vrot.lane.b32.xlu0 %v748_v50, %s635_s15 }
  0x40   : > { %238 = vrot.lane.b32.xlu1 %v752_v51, %s635_s15 }
  0x43   : > { %245 = vrot.lane.b32.xlu0 %v748_v50, %s636_s16 }
  0x44   : > { %247 = vrot.lane.b32.xlu1 %v752_v51, %s636_s16 }
  0x89   : > { %v306_v52 = vpop.permute.xlu0 %305 }
  0x8a   : > { %v320_v53 = vpop.permute.xlu1 %319  ;;  %v314_v61 = vadd.f32 %v311_v57, %v306_v52 }
  0x8d   : > { %v308_v54 = vpop.permute.xlu0 %307 }
  0x8e   : > { %v291_v55 = vpop.permute.xlu1 %290  ;;  %v315_v60 = vadd.f32 %v312_v56, %v308_v54 }
  0x90   : > { %v324_v6 = vadd.f32 %v320_v53, %v315_v60 }
  0x91   : > { %v318_v58 = vpop.permute.xlu0 %317 }
  0x92   : > { %v293_v59 = vpop.permute.xlu1 %292  ;;  %v323_v4 = vadd.f32 %v318_v58, %v314_v61  ;;  %v363_v13 = vand.u32 2147483647, %v324_v6 }
  0x94   : > { %v362_v11 = vand.u32 2147483647, %v323_v4  ;;  %v366_v27 = vmul.f32 -10.0, %v363_v13 }
  0x95   : > { %v297_v62 = vpop.permute.xlu0 %296 }
  0x96   : > { %v302_v63 = vsub.f32 %v291_v55, %v297_v62  ;;  %v299_v1 = vpop.permute.xlu1 %298  ;;  %v365_v22 = vmul.f32 -10.0, %v362_v11 }
  0x97   : > { %v303_v5 = vsub.f32 %v293_v59, %v299_v1 }
  0x98   : > { %v350_v7 = vand.u32 2147483647, %v302_v63  ;;  %v368_v35 = vmul.f32 1.442695, %v365_v22 }
  0x99   : > { %v351_v8 = vand.u32 2147483647, %v303_v5  ;;  %v327_v9 = vpop.permute.xlu0 %326 }
  0x9a   : > { %v329_v10 = vpop.permute.xlu1 %328  ;;  %v353_v12 = vmul.f32 -10.0, %v350_v7  ;;  %v332_v15 = vadd.f32 %v327_v9, %v709_v28  ;;  %v370_v28 = vmul.f32 1.442695, %v366_v27 }
  0x9b   : > { %v354_v14 = vmul.f32 -10.0, %v351_v8  ;;  %v333_v16 = vadd.f32 %v329_v10, %v713_v30 }
  0x9c   : > { %v356_v23 = vmul.f32 1.442695, %v353_v12 }
  0x9d   : > { %v336_v18 = vpop.permute.xlu0 %335  ;;  %v358_v29 = vmul.f32 1.442695, %v354_v14  ;;  %v254_v14 = vmul.f32 9.0, %v704_v25 }
  0x9e   : > { %v341_v19 = vadd.f32 %v336_v18, %v332_v15  ;;  %v338_v21 = vpop.permute.xlu1 %337  ;;  %603 = vpow2.f32 %v356_v23  ;;  %v255_v18 = vmul.f32 9.0, %v706_v26 }
  0x9f   : > { %v342_v24 = vadd.f32 %v338_v21, %v333_v16  ;;  %605 = vpow2.f32 %v358_v29 }
  0xa0   : > { %v347_v31 = vsub.f32 %v344_v17, %v341_v19  ;;  %607 = vpow2.f32 %v368_v35 }
  0xa1   : > { %v216_v32 = vpop.permute.xlu0 %215  ;;  %v348_v33 = vsub.f32 %v345_v20, %v342_v24  ;;  %609 = vpow2.f32 %v370_v28 }
  0xa2   : > { %v218_v34 = vpop.permute.xlu1 %217  ;;  %v440_v30 = vand.u32 2147483647, %v347_v31  ;;  %v224_v47 = vadd.f32 %v221_v3, %v216_v32 }
  0xa3   : > { %v441_v36 = vand.u32 2147483647, %v348_v33  ;;  %v225_v53 = vadd.f32 %v222_v39, %v218_v34 }
  0xa4   : > { %v443_v38 = vmul.f32 -10.0, %v440_v30 }
  0xa5   : > { %v201_v2 = vpop.permute.xlu0 %200  ;;  %v444_v41 = vmul.f32 -10.0, %v441_v36 }
  0xa6   : > { %v203_v37 = vpop.permute.xlu1 %202  ;;  %v446_v52 = vmul.f32 1.442695, %v443_v38 }
  0xa7   : > { %v448_v57 = vmul.f32 1.442695, %v444_v41 }
  0xa8   : > { %v604_v49 = vpop.eup %603  ;;  %611 = vpow2.f32 %v446_v52 }
  0xa9   : > { %v207_v40 = vpop.permute.xlu0 %206  ;;  %v606_v56 = vpop.eup %605  ;;  %613 = vpow2.f32 %v448_v57 }
  0xaa   : > { %v212_v43 = vsub.f32 %v201_v2, %v207_v40  ;;  %v209_v45 = vpop.permute.xlu1 %208  ;;  %v608_v63 = vpop.eup %607 }
  0xab   : > { %v213_v46 = vsub.f32 %v203_v37, %v209_v45  ;;  %v610_v6 = vpop.eup %609 }
  0xac   : > { %v374_v48 = vand.u32 2147483647, %v212_v43 }
  0xad   : > { %v375_v54 = vand.u32 2147483647, %v213_v46  ;;  %v228_v55 = vpop.permute.xlu0 %227 }
  0xae   : > { %v377_v58 = vmul.f32 %v604_v49, %v374_v48  ;;  %v233_v59 = vadd.f32 %v228_v55, %v224_v47  ;;  %v230_v42 = vpop.permute.xlu1 %229 }
  0xaf   : > { %v378_v60 = vmul.f32 %v606_v56, %v375_v54  ;;  %v234_v61 = vadd.f32 %v230_v42, %v225_v53 }
  0xb0   : > { %v380_v44 = vmul.f32 %v377_v58, %v377_v58  ;;  %v407_v62 = vand.u32 2147483647, %v233_v59  ;;  %v497_v58 = vand.u32 127, %v169_v0 }
  0xb1   : > { %v381_v1 = vmul.f32 %v378_v60, %v378_v60  ;;  %v408_v4 = vand.u32 2147483647, %v234_v61  ;;  %v237_v5 = vpop.permute.xlu0 %236 }
  0xb2   : > { %v383_v7 = vadd.f32 1e-06, %v380_v44  ;;  %v410_v8 = vmul.f32 %v608_v63, %v407_v62  ;;  %v239_v9 = vpop.permute.xlu1 %238  ;;  %v242_v13 = vadd.f32 %v237_v5, %v748_v50  ;;  %v612_v25 = vpop.eup %611  ;;  %vm501_vm13 = vcmp.lt.s32.totalorder %v497_v58, 16 }
  0xb3   : > { %v770_v10 = vadd.f32 1e-06, %v381_v1  ;;  %v411_v11 = vmul.f32 %v610_v6, %v408_v4  ;;  %v243_v16 = vadd.f32 %v239_v9, %v752_v51  ;;  %v614_v31 = vpop.eup %613 }
  0xb4   : > { %v413_v12 = vmul.f32 %v410_v8, %v410_v8  ;;  %615 = vrsqrt.f32 %v383_v7  ;;  %vm388_vm3 = vcmp.eq.f32.partialorder %v383_v7, inf  ;;  %v391_v46 = vand.u32 2147483648, %v383_v7 }
  0xb5   : > { %v414_v15 = vmul.f32 %v411_v11, %v411_v11  ;;  %v246_v17 = vpop.permute.xlu0 %245  ;;  %617 = vrsqrt.f32 %v770_v10  ;;  %vm395_vm6 = vcmp.eq.f32.partialorder %v770_v10, inf  ;;  %vm390_vm7 = vcmp.eq.f32.partialorder %v383_v7, 0.0 }
  0xb6   : > { %v416_v19 = vadd.f32 1e-06, %v413_v12  ;;  %v251_v20 = vadd.f32 %v246_v17, %v242_v13  ;;  %v248_v21 = vpop.permute.xlu1 %247  ;;  %v398_v53 = vand.u32 2147483648, %v770_v10  ;;  %vm397_vm9 = vcmp.eq.f32.partialorder %v770_v10, 0.0 }
  0xb7   : > { %v417_v22 = vadd.f32 1e-06, %v414_v15  ;;  %v252_v23 = vadd.f32 %v248_v21, %v243_v16 }
  0xb8   : > { %619 = vrsqrt.f32 %v416_v19  ;;  %v257_v24 = vsub.f32 %v254_v14, %v251_v20  ;;  %vm421_vm2 = vcmp.eq.f32.partialorder %v416_v19, inf  ;;  %v424_v41 = vand.u32 2147483648, %v416_v19 }
  0xb9   : > { %621 = vrsqrt.f32 %v417_v22  ;;  %v258_v50 = vsub.f32 %v255_v18, %v252_v23  ;;  %vm428_vm4 = vcmp.eq.f32.partialorder %v417_v22, inf  ;;  %vm423_vm5 = vcmp.eq.f32.partialorder %v416_v19, 0.0 }
  0xba   : > { %v452_v27 = vand.u32 2147483647, %v257_v24  ;;  %v431_v48 = vand.u32 2147483648, %v417_v22  ;;  %vm430_vm8 = vcmp.eq.f32.partialorder %v417_v22, 0.0 }
  0xbb   : > { %v453_v29 = vand.u32 2147483647, %v258_v50 }
  0xbc   : > { %v455_v51 = vmul.f32 %v612_v25, %v452_v27 }
  0xbd   : > { %v456_v32 = vmul.f32 %v614_v31, %v453_v29 }
  0xbe   : > { %v458_v33 = vmul.f32 %v455_v51, %v455_v51  ;;  %v616_v34 = vpop.eup %615 }
  0xbf   : > { %v459_v26 = vmul.f32 %v456_v32, %v456_v32  ;;  %v618_v28 = vpop.eup %617  ;;  %v387_v37 = vmul.f32 %v616_v34, %v383_v7 }
  0xc0   : > { %v461_v35 = vadd.f32 1e-06, %v458_v33  ;;  %v394_v39 = vmul.f32 %v618_v28, %v770_v10 }
  0xc1   : > { %v462_v30 = vadd.f32 1e-06, %v459_v26  ;;  %v389_v43 = vsel %vm388_vm3, %v383_v7, %v387_v37 }
  0xc2   : > { %v620_v2 = vpop.eup %619  ;;  %623 = vrsqrt.f32 %v461_v35  ;;  %v396_v49 = vsel %vm395_vm6, %v770_v10, %v394_v39  ;;  %v392_v52 = vsel %vm390_vm7, %v391_v46, %v389_v43  ;;  %vm466_vm10 = vcmp.eq.f32.partialorder %v461_v35, inf }
  0xc3   : > { %v622_v36 = vpop.eup %621  ;;  %v420_v3 = vmul.f32 %v620_v2, %v416_v19  ;;  %625 = vrsqrt.f32 %v462_v30  ;;  %v399_v57 = vsel %vm397_vm9, %v398_v53, %v396_v49  ;;  %v469_v61 = vand.u32 2147483648, %v461_v35 }
  0xc4   : > { %v427_v38 = vmul.f32 %v622_v36, %v417_v22  ;;  %vm468_vm11 = vcmp.eq.f32.partialorder %v461_v35, 0.0  ;;  %vm473_vm12 = vcmp.eq.f32.partialorder %v462_v30, inf  ;;  %v476_v4 = vand.u32 2147483648, %v462_v30 }
  0xc5   : > { %v422_v40 = vsel %vm421_vm2, %v416_v19, %v420_v3  ;;  %vm475_vm14 = vcmp.eq.f32.partialorder %v462_v30, 0.0 }
  0xc6   : > { %v429_v45 = vsel %vm428_vm4, %v417_v22, %v427_v38  ;;  %v425_v47 = vsel %vm423_vm5, %v424_v41, %v422_v40 }
  0xc7   : > { %v432_v54 = vsel %vm430_vm8, %v431_v48, %v429_v45  ;;  %v485_v55 = vadd.f32 %v425_v47, %v392_v52 }
  0xc8   : > { %v486_v42 = vadd.f32 %v432_v54, %v399_v57 }
  0xc9   : > { %v488_v63 = vmul.f32 10.0, %v485_v55 }
  0xca   : > { %v489_v6 = vmul.f32 10.0, %v486_v42 }
  0xcc   : > { %v624_v56 = vpop.eup %623 }
  0xcd   : > { %v465_v59 = vmul.f32 %v624_v56, %v461_v35  ;;  %v626_v60 = vpop.eup %625 }
  0xce   : > { %v472_v62 = vmul.f32 %v626_v60, %v462_v30 }
  0xcf   : > { %v467_v44 = vsel %vm466_vm10, %v461_v35, %v465_v59 }
  0xd0   : > { %v470_v1 = vsel %vm468_vm11, %v469_v61, %v467_v44  ;;  %v474_v5 = vsel %vm473_vm12, %v462_v30, %v472_v62 }
  0xd1   : > { %v491_v7 = vadd.f32 %v488_v63, %v470_v1  ;;  %v477_v8 = vsel %vm475_vm14, %v476_v4, %v474_v5 }
  0xd2   : > { %v492_v0 = vadd.f32 %v489_v6, %v477_v8 }
  0xd3   : > { %v505_v9 = vsel %vm501_vm13, %v491_v7, 0.0 }
  0xd4   : > { %v506_v10 = vsel %vm501_vm13, %v492_v0, 0.0 }
  0xd5   : > { %v508_v11 = vadd.f32 %v506_v10, %v505_v9 }
  0xd7   : > { %510 = vadd.xlane.f32.xlu0 %v508_v11 }
 0x164   : > { %v511_v12 = vpop.xlane.xlu0 %510 }
 0x165   : > { %v512_v13 = vrot.slane %v511_v12, 4 }
 0x167   : > { %v513_v14 = vadd.f32 %v512_v13, %v511_v12 }
 0x169   : > { %v514_v15 = vrot.slane %v513_v14, 2 }
 0x16b   : > { %v515_v16 = vadd.f32 %v514_v15, %v513_v14 }
 0x16d   : > { %v516_v17 = vrot.slane %v515_v16, 1 }
 0x16f   : > { %v517_v18 = vadd.f32 %v516_v17, %v515_v16 }
 0x171   : > { %591 = vpush %v517_v18 }
 0x1a2   : > { %s592_s23 = spop %591 }
 0x1a3   : > { %v519_v19 = vstv %s592_s23 }
 0x1a4   : > { %521 = vst.msk [vmem:[%s159_s22] sm:$0x1] %vm520_vm15, %v519_v19 }
 0x1a5 PF: > { %s12_s9 = sadd.s32 1, %s633_s9  }
 0x1a6   : > { %p9_p4 = scmp.ge.s32.totalorder %s12_s9, 4  }
 0x1a8   :  { %11 = sbr.rel (!%p9_p4) target bundleno = 1 (0x1), region = 61 }

</bundles_post_ra>
